<compile_context>
chip_gen: v7x
topology: tpu7x:2x2x1
jax: 0.10.0
libtpu: 0.0.40
codegen_flags: <defaults>
</compile_context>

<pallas_src>
import functools

import jax
import jax.numpy as jnp
import numpy as np
from jax import lax
from jax.experimental import pallas as pl
from jax.experimental.pallas import tpu as pltpu

EPS = 1e-6

PARAM_ORDER = [
    "ln1_a", "ln1_b",
    "wq", "bq", "wk", "bk", "wv", "bv", "wo", "bo",
    "ln2_a", "ln2_b",
    "w1", "b1", "w2", "b2",
]

# Large matmul weights get cast to the compute dtype at the pallas_call boundary.
MATMUL_WEIGHTS = frozenset({"wq", "wk", "wv", "wo", "w1", "w2"})


def _layernorm(v, a, b, eps=EPS):
    # Matches torch: std = x.std(-1) (unbiased), then (x - mean) / sqrt(std**2 + eps).
    d = v.shape[-1]
    mean = jnp.mean(v, axis=-1, keepdims=True)
    var_unbiased = jnp.sum((v - mean) ** 2, axis=-1, keepdims=True) / (d - 1)
    return a * ((v - mean) * lax.rsqrt(var_unbiased + eps)) + b


def encoder_layer_kernel(x_ref, mask_ref,
                         ln1_a_ref, ln1_b_ref,
                         wq_ref, bq_ref, wk_ref, bk_ref, wv_ref, bv_ref,
                         wo_ref, bo_ref,
                         ln2_a_ref, ln2_b_ref,
                         w1_ref, b1_ref, w2_ref, b2_ref,
                         o_ref, ctx_ref, *, num_heads, compute_dtype):
    f32 = jnp.float32
    x = x_ref[0]                                   # (S, D) float32
    S, D = x.shape
    dh = D // num_heads
    inv_sqrt_dh = 1.0 / float(np.sqrt(dh))

    # ---------- sublayer[0]: x + SelfAttn(LayerNorm(x)) ----------
    xn = _layernorm(x, ln1_a_ref[0], ln1_b_ref[0])
    xn_c = xn.astype(compute_dtype)

    q = jnp.dot(xn_c, wq_ref[...], preferred_element_type=f32) + bq_ref[0]
    k = jnp.dot(xn_c, wk_ref[...], preferred_element_type=f32) + bk_ref[0]
    v = jnp.dot(xn_c, wv_ref[...], preferred_element_type=f32) + bv_ref[0]

    # Fold the 1/sqrt(dh) scale into q (O(S*D) multiplies vs O(H*S^2) on the scores).
    q = q * inv_sqrt_dh

    # Hoisted additive mask bias: one compare/select instead of H.
    bias = jnp.where(mask_ref[0] == 0, f32(-1e9), f32(0.0))   # (1, S) -> bcast over (S, S)

    q_c = q.astype(compute_dtype)
    k_c = k.astype(compute_dtype)
    v_c = v.astype(compute_dtype)

    # q @ k^T via dimension_numbers (no explicit transpose materialized).
    score_dnums = (((1,), (1,)), ((), ()))

    # Static Python loop over heads (H is small & static): lane offsets stay static so
    # Mosaic sees only plain 2-D matmuls / slices; each head's (S,S) scores die inside the
    # iteration because the result is stored directly into the ctx scratch slice.
    for h in range(num_heads):
        lo = h * dh
        qh = q_c[:, lo:lo + dh]                    # (S, dh)
        kh = k_c[:, lo:lo + dh]
        vh = v_c[:, lo:lo + dh]

        s = lax.dot_general(qh, kh, score_dnums, preferred_element_type=f32)  # (S, S)
        s = s + bias
        s = s - jnp.max(s, axis=-1, keepdims=True)
        p = jnp.exp(s)
        denom = jnp.sum(p, axis=-1, keepdims=True)                            # (S, 1)

        oh = jnp.dot(p.astype(compute_dtype), vh, preferred_element_type=f32)  # (S, dh)
        # Normalize after p@v: (S,dh) multiply instead of an (S,S) divide; EUP reciprocal.
        oh = oh * pl.reciprocal(denom, approx=True)

        ctx_ref[:, lo:lo + dh] = oh                # write head output straight into scratch

    ctx = ctx_ref[...].astype(compute_dtype)       # (S, D)
    attn_out = jnp.dot(ctx, wo_ref[...], preferred_element_type=f32) + bo_ref[0]
    x1 = x + attn_out                              # dropout == identity (eval mode)

    # ---------- sublayer[1]: x1 + FFN(LayerNorm(x1)) ----------
    xn2 = _layernorm(x1, ln2_a_ref[0], ln2_b_ref[0])
    h1 = jnp.dot(xn2.astype(compute_dtype), w1_ref[...], preferred_element_type=f32) + b1_ref[0]
    h1 = jnp.maximum(h1, 0.0)
    ff = jnp.dot(h1.astype(compute_dtype), w2_ref[...], preferred_element_type=f32) + b2_ref[0]

    o_ref[0] = (x1 + ff).astype(o_ref.dtype)


def _vmem_limit_bytes():
    # Per-generation scoped-VMEM limit: physical minus headroom, clamped to [32, 100] MiB
    # (~100 MiB on v5e/v6e with 128 MiB VMEM, ~48 MiB on v7x with 64 MiB per TC).
    try:
        phys = int(pltpu.get_tpu_info().vmem_capacity_bytes)
        return int(min(max(phys - (16 << 20), 32 << 20), 100 << 20))
    except Exception:
        return 32 << 20


def encoder_layer(x, mask, params, *, num_heads, compute_dtype=jnp.float32):
    B, S, D = x.shape
    mask = mask.astype(jnp.float32)

    # Cast the big matmul weights to the compute dtype at the call boundary (halves their
    # HBM/VMEM footprint in bf16 mode); LayerNorm params and biases stay float32.
    args = []
    for name in PARAM_ORDER:
        p = params[name]
        if name in MATMUL_WEIGHTS:
            p = p.astype(compute_dtype)
        args.append(p)

    def full_spec(arr):
        nd = arr.ndim
        return pl.BlockSpec(arr.shape, lambda b, _nd=nd: (0,) * _nd)

    in_specs = [
        pl.BlockSpec((1, S, D), lambda b: (b, 0, 0)),   # x, per-batch tile
        pl.BlockSpec((1, 1, S), lambda b: (b, 0, 0)),   # mask, per-batch tile
    ] + [full_spec(a) for a in args]

    kernel = functools.partial(encoder_layer_kernel,
                               num_heads=num_heads,
                               compute_dtype=compute_dtype)

    return pl.pallas_call(
        kernel,
        out_shape=jax.ShapeDtypeStruct((B, S, D), x.dtype),
        grid_spec=pltpu.PrefetchScalarGridSpec(
            num_scalar_prefetch=0,
            grid=(B,),
            in_specs=in_specs,
            out_specs=pl.BlockSpec((1, S, D), lambda b: (b, 0, 0)),
            scratch_shapes=[pltpu.VMEM((S, D), jnp.float32)],   # per-head context accumulator
        ),
        compiler_params=pltpu.CompilerParams(
            dimension_semantics=("parallel",),
            vmem_limit_bytes=_vmem_limit_bytes()),
    )(x, mask, *args)


def reference(x, mask, params, num_heads):
    # Pure-JAX reference mirroring the PyTorch forward (eval mode).
    def ln(v, a, b):
        d = v.shape[-1]
        mean = jnp.mean(v, -1, keepdims=True)
        var = jnp.sum((v - mean) ** 2, -1, keepdims=True) / (d - 1)
        return a * (v - mean) / jnp.sqrt(var + EPS) + b

    B, S, D = x.shape
    dh = D // num_heads
    xn = ln(x, params["ln1_a"][0], params["ln1_b"][0])
    q = xn @ params["wq"] + params["bq"][0]
    k = xn @ params["wk"] + params["bk"][0]
    v = xn @ params["wv"] + params["bv"][0]
    q = q.reshape(B, S, num_heads, dh).transpose(0, 2, 1, 3)
    k = k.reshape(B, S, num_heads, dh).transpose(0, 2, 1, 3)
    v = v.reshape(B, S, num_heads, dh).transpose(0, 2, 1, 3)
    scores = (q @ k.transpose(0, 1, 3, 2)) / np.sqrt(dh)      # (B,h,S,S)
    m = mask[:, None, :, :]                                   # (B,1,1,S)
    scores = jnp.where(m == 0, -1e9, scores)
    p = jax.nn.softmax(scores, axis=-1)
    ctx = (p @ v).transpose(0, 2, 1, 3).reshape(B, S, D)
    x1 = x + (ctx @ params["wo"] + params["bo"][0])
    xn2 = ln(x1, params["ln2_a"][0], params["ln2_b"][0])
    h = jax.nn.relu(xn2 @ params["w1"] + params["b1"][0])
    return x1 + (h @ params["w2"] + params["b2"][0])


def make_params(key, d_model, d_ff):
    ks = jax.random.split(key, 12)
    scale = 0.1
    return {
        "ln1_a": jnp.ones((1, d_model), jnp.float32),
        "ln1_b": jnp.zeros((1, d_model), jnp.float32),
        "wq": scale * jax.random.normal(ks[0], (d_model, d_model), jnp.float32),
        "bq": scale * jax.random.normal(ks[1], (1, d_model), jnp.float32),
        "wk": scale * jax.random.normal(ks[2], (d_model, d_model), jnp.float32),
        "bk": scale * jax.random.normal(ks[3], (1, d_model), jnp.float32),
        "wv": scale * jax.random.normal(ks[4], (d_model, d_model), jnp.float32),
        "bv": scale * jax.random.normal(ks[5], (1, d_model), jnp.float32),
        "wo": scale * jax.random.normal(ks[6], (d_model, d_model), jnp.float32),
        "bo": scale * jax.random.normal(ks[7], (1, d_model), jnp.float32),
        "ln2_a": jnp.ones((1, d_model), jnp.float32),
        "ln2_b": jnp.zeros((1, d_model), jnp.float32),
        "w1": scale * jax.random.normal(ks[8], (d_model, d_ff), jnp.float32),
        "b1": scale * jax.random.normal(ks[9], (1, d_ff), jnp.float32),
        "w2": scale * jax.random.normal(ks[10], (d_ff, d_model), jnp.float32),
        "b2": scale * jax.random.normal(ks[11], (1, d_model), jnp.float32),
    }


if __name__ == "__main__":
    B, S, D, H, DFF = 2, 8, 32, 4, 64

    key = jax.random.PRNGKey(0)
    kx, kp = jax.random.split(key)
    x = jax.random.normal(kx, (B, S, D), jnp.float32)
    params = make_params(kp, D, DFF)

    # mask: (B, 1, S); batch 0 fully visible, batch 1 has last 2 key positions masked.
    lengths = jnp.array([S, S - 2])
    mask = (jnp.arange(S)[None, None, :] < lengths[:, None, None]).astype(jnp.float32)

    ref = reference(x, mask, params, H)

    # float32 matmul path (approx EUP reciprocal in softmax -> slightly loosened tolerance).
    out_f32 = jax.block_until_ready(encoder_layer(x, mask, params, num_heads=H))
    np.testing.assert_allclose(np.asarray(out_f32), np.asarray(ref), rtol=2e-3, atol=2e-3)

    # bf16 matmul path (MXU-friendly on v6e/v7x); accumulation / norms / residuals stay f32.
    out_bf16 = jax.block_until_ready(
        encoder_layer(x, mask, params, num_heads=H, compute_dtype=jnp.bfloat16))
    np.testing.assert_allclose(np.asarray(out_bf16), np.asarray(ref), rtol=5e-2, atol=5e-2)

    print("KERNEL_OK")
</pallas_src>

<mosaic_0001>
module attributes {stable_mosaic.version = 11 : i64} {
  func.func @encoder_layer_kernel(%arg0: i32, %arg1: memref<1x8x32xf32, #tpu.memory_space<vmem>>, %arg2: memref<1x1x8xf32, #tpu.memory_space<vmem>>, %arg3: memref<1x32xf32, #tpu.memory_space<vmem>>, %arg4: memref<1x32xf32, #tpu.memory_space<vmem>>, %arg5: memref<32x32xf32, #tpu.memory_space<vmem>>, %arg6: memref<1x32xf32, #tpu.memory_space<vmem>>, %arg7: memref<32x32xf32, #tpu.memory_space<vmem>>, %arg8: memref<1x32xf32, #tpu.memory_space<vmem>>, %arg9: memref<32x32xf32, #tpu.memory_space<vmem>>, %arg10: memref<1x32xf32, #tpu.memory_space<vmem>>, %arg11: memref<32x32xf32, #tpu.memory_space<vmem>>, %arg12: memref<1x32xf32, #tpu.memory_space<vmem>>, %arg13: memref<1x32xf32, #tpu.memory_space<vmem>>, %arg14: memref<1x32xf32, #tpu.memory_space<vmem>>, %arg15: memref<32x64xf32, #tpu.memory_space<vmem>>, %arg16: memref<1x64xf32, #tpu.memory_space<vmem>>, %arg17: memref<64x32xf32, #tpu.memory_space<vmem>>, %arg18: memref<1x32xf32, #tpu.memory_space<vmem>>, %arg19: memref<1x8x32xf32, #tpu.memory_space<vmem>>, %arg20: memref<8x32xf32, #tpu.memory_space<vmem>>) attributes {dimension_semantics = [#tpu.dimension_semantics<parallel>], iteration_bounds = array<i64: 2>, scalar_prefetch = 0 : i64, scratch_operands = 1 : i64, tpu.core_type = #tpu.core_type<tc>, window_params = [{transform_indices = @transform_0, window_bounds = array<i64: 1, 8, 32>}, {transform_indices = @transform_1, window_bounds = array<i64: 1, 1, 8>}, {pipeline_mode = #tpu.pipeline_mode<synchronous>, transform_indices = @transform_2, window_bounds = array<i64: 1, 32>}, {pipeline_mode = #tpu.pipeline_mode<synchronous>, transform_indices = @transform_3, window_bounds = array<i64: 1, 32>}, {pipeline_mode = #tpu.pipeline_mode<synchronous>, transform_indices = @transform_4, window_bounds = array<i64: 32, 32>}, {pipeline_mode = #tpu.pipeline_mode<synchronous>, transform_indices = @transform_5, window_bounds = array<i64: 1, 32>}, {pipeline_mode = #tpu.pipeline_mode<synchronous>, transform_indices = @transform_6, window_bounds = array<i64: 32, 32>}, {pipeline_mode = #tpu.pipeline_mode<synchronous>, transform_indices = @transform_7, window_bounds = array<i64: 1, 32>}, {pipeline_mode = #tpu.pipeline_mode<synchronous>, transform_indices = @transform_8, window_bounds = array<i64: 32, 32>}, {pipeline_mode = #tpu.pipeline_mode<synchronous>, transform_indices = @transform_9, window_bounds = array<i64: 1, 32>}, {pipeline_mode = #tpu.pipeline_mode<synchronous>, transform_indices = @transform_10, window_bounds = array<i64: 32, 32>}, {pipeline_mode = #tpu.pipeline_mode<synchronous>, transform_indices = @transform_11, window_bounds = array<i64: 1, 32>}, {pipeline_mode = #tpu.pipeline_mode<synchronous>, transform_indices = @transform_12, window_bounds = array<i64: 1, 32>}, {pipeline_mode = #tpu.pipeline_mode<synchronous>, transform_indices = @transform_13, window_bounds = array<i64: 1, 32>}, {pipeline_mode = #tpu.pipeline_mode<synchronous>, transform_indices = @transform_14, window_bounds = array<i64: 32, 64>}, {pipeline_mode = #tpu.pipeline_mode<synchronous>, transform_indices = @transform_15, window_bounds = array<i64: 1, 64>}, {pipeline_mode = #tpu.pipeline_mode<synchronous>, transform_indices = @transform_16, window_bounds = array<i64: 64, 32>}, {pipeline_mode = #tpu.pipeline_mode<synchronous>, transform_indices = @transform_17, window_bounds = array<i64: 1, 32>}, {transform_indices = @transform_18, window_bounds = array<i64: 1, 8, 32>}]} {
    %c0 = arith.constant 0 : index
    %c0_0 = arith.constant 0 : index
    %c0_1 = arith.constant 0 : index
    %0 = vector.load %arg1[%c0, %c0_0, %c0_1] : memref<1x8x32xf32, #tpu.memory_space<vmem>>, vector<1x8x32xf32>
    %1 = vector.shape_cast %0 : vector<1x8x32xf32> to vector<8x32xf32>
    %c0_2 = arith.constant 0 : index
    %c0_3 = arith.constant 0 : index
    %2 = vector.load %arg3[%c0_2, %c0_3] : memref<1x32xf32, #tpu.memory_space<vmem>>, vector<1x32xf32>
    %3 = vector.shape_cast %2 : vector<1x32xf32> to vector<32xf32>
    %c0_4 = arith.constant 0 : index
    %c0_5 = arith.constant 0 : index
    %4 = vector.load %arg4[%c0_4, %c0_5] : memref<1x32xf32, #tpu.memory_space<vmem>>, vector<1x32xf32>
    %5 = vector.shape_cast %4 : vector<1x32xf32> to vector<32xf32>
    %cst = arith.constant dense<0.000000e+00> : vector<8xf32>
    %6 = vector.multi_reduction <add>, %1, %cst [1] : vector<8x32xf32> to vector<8xf32>
    %7 = vector.shape_cast %6 : vector<8xf32> to vector<8x1xf32>
    %cst_6 = arith.constant 3.200000e+01 : f32
    %8 = vector.broadcast %cst_6 : f32 to vector<8x1xf32>
    %9 = arith.divf %7, %8 : vector<8x1xf32>
    %10 = vector.broadcast %9 : vector<8x1xf32> to vector<8x32xf32>
    %11 = arith.subf %1, %10 : vector<8x32xf32>
    %12 = arith.mulf %11, %11 : vector<8x32xf32>
    %cst_7 = arith.constant dense<0.000000e+00> : vector<8xf32>
    %13 = vector.multi_reduction <add>, %12, %cst_7 [1] : vector<8x32xf32> to vector<8xf32>
    %14 = vector.shape_cast %13 : vector<8xf32> to vector<8x1xf32>
    %cst_8 = arith.constant 3.100000e+01 : f32
    %15 = vector.broadcast %cst_8 : f32 to vector<8x1xf32>
    %16 = arith.divf %14, %15 : vector<8x1xf32>
    %17 = vector.broadcast %9 : vector<8x1xf32> to vector<8x32xf32>
    %18 = arith.subf %1, %17 : vector<8x32xf32>
    %cst_9 = arith.constant 9.99999997E-7 : f32
    %19 = vector.broadcast %cst_9 : f32 to vector<8x1xf32>
    %20 = arith.addf %16, %19 : vector<8x1xf32>
    %21 = math.rsqrt %20 : vector<8x1xf32>
    %22 = vector.broadcast %21 : vector<8x1xf32> to vector<8x32xf32>
    %23 = arith.mulf %18, %22 : vector<8x32xf32>
    %24 = vector.shape_cast %3 : vector<32xf32> to vector<1x32xf32>
    %25 = vector.broadcast %24 : vector<1x32xf32> to vector<8x32xf32>
    %26 = arith.mulf %25, %23 : vector<8x32xf32>
    %27 = vector.shape_cast %5 : vector<32xf32> to vector<1x32xf32>
    %28 = vector.broadcast %27 : vector<1x32xf32> to vector<8x32xf32>
    %29 = arith.addf %26, %28 : vector<8x32xf32>
    %c0_10 = arith.constant 0 : index
    %c0_11 = arith.constant 0 : index
    %30 = vector.load %arg5[%c0_10, %c0_11] : memref<32x32xf32, #tpu.memory_space<vmem>>, vector<32x32xf32>
    %cst_12 = arith.constant dense<0.000000e+00> : vector<8x32xf32>
    %31 = tpu.matmul %29, %30, %cst_12 {dimension_numbers = #tpu.dot_dimension_numbers<[1], [0], [0], [1], [0, 0, 1, 1], [], []>} : vector<8x32xf32>, vector<32x32xf32>, vector<8x32xf32> -> vector<8x32xf32>
    %c0_13 = arith.constant 0 : index
    %c0_14 = arith.constant 0 : index
    %32 = vector.load %arg6[%c0_13, %c0_14] : memref<1x32xf32, #tpu.memory_space<vmem>>, vector<1x32xf32>
    %33 = vector.shape_cast %32 : vector<1x32xf32> to vector<32xf32>
    %34 = vector.shape_cast %33 : vector<32xf32> to vector<1x32xf32>
    %35 = vector.broadcast %34 : vector<1x32xf32> to vector<8x32xf32>
    %36 = arith.addf %31, %35 : vector<8x32xf32>
    %c0_15 = arith.constant 0 : index
    %c0_16 = arith.constant 0 : index
    %37 = vector.load %arg7[%c0_15, %c0_16] : memref<32x32xf32, #tpu.memory_space<vmem>>, vector<32x32xf32>
    %cst_17 = arith.constant dense<0.000000e+00> : vector<8x32xf32>
    %38 = tpu.matmul %29, %37, %cst_17 {dimension_numbers = #tpu.dot_dimension_numbers<[1], [0], [0], [1], [0, 0, 1, 1], [], []>} : vector<8x32xf32>, vector<32x32xf32>, vector<8x32xf32> -> vector<8x32xf32>
    %c0_18 = arith.constant 0 : index
    %c0_19 = arith.constant 0 : index
    %39 = vector.load %arg8[%c0_18, %c0_19] : memref<1x32xf32, #tpu.memory_space<vmem>>, vector<1x32xf32>
    %40 = vector.shape_cast %39 : vector<1x32xf32> to vector<32xf32>
    %41 = vector.shape_cast %40 : vector<32xf32> to vector<1x32xf32>
    %42 = vector.broadcast %41 : vector<1x32xf32> to vector<8x32xf32>
    %43 = arith.addf %38, %42 : vector<8x32xf32>
    %c0_20 = arith.constant 0 : index
    %c0_21 = arith.constant 0 : index
    %44 = vector.load %arg9[%c0_20, %c0_21] : memref<32x32xf32, #tpu.memory_space<vmem>>, vector<32x32xf32>
    %cst_22 = arith.constant dense<0.000000e+00> : vector<8x32xf32>
    %45 = tpu.matmul %29, %44, %cst_22 {dimension_numbers = #tpu.dot_dimension_numbers<[1], [0], [0], [1], [0, 0, 1, 1], [], []>} : vector<8x32xf32>, vector<32x32xf32>, vector<8x32xf32> -> vector<8x32xf32>
    %c0_23 = arith.constant 0 : index
    %c0_24 = arith.constant 0 : index
    %46 = vector.load %arg10[%c0_23, %c0_24] : memref<1x32xf32, #tpu.memory_space<vmem>>, vector<1x32xf32>
    %47 = vector.shape_cast %46 : vector<1x32xf32> to vector<32xf32>
    %48 = vector.shape_cast %47 : vector<32xf32> to vector<1x32xf32>
    %49 = vector.broadcast %48 : vector<1x32xf32> to vector<8x32xf32>
    %50 = arith.addf %45, %49 : vector<8x32xf32>
    %cst_25 = arith.constant 0.353553385 : f32
    %51 = vector.broadcast %cst_25 : f32 to vector<8x32xf32>
    %52 = arith.mulf %36, %51 : vector<8x32xf32>
    %c0_26 = arith.constant 0 : index
    %c0_27 = arith.constant 0 : index
    %c0_28 = arith.constant 0 : index
    %53 = vector.load %arg2[%c0_26, %c0_27, %c0_28] : memref<1x1x8xf32, #tpu.memory_space<vmem>>, vector<1x1x8xf32>
    %54 = vector.shape_cast %53 : vector<1x1x8xf32> to vector<1x8xf32>
    %cst_29 = arith.constant 0.000000e+00 : f32
    %55 = vector.broadcast %cst_29 : f32 to vector<1x8xf32>
    %56 = arith.cmpf oeq, %54, %55 : vector<1x8xf32>
    %cst_30 = arith.constant -1.000000e+09 : f32
    %cst_31 = arith.constant 0.000000e+00 : f32
    %57 = vector.broadcast %cst_30 : f32 to vector<1x8xf32>
    %58 = vector.broadcast %cst_31 : f32 to vector<1x8xf32>
    %59 = arith.select %56, %57, %58 : vector<1x8xi1>, vector<1x8xf32>
    %60 = vector.extract_strided_slice %52 {offsets = [0, 0], sizes = [8, 8], strides = [1, 1]} : vector<8x32xf32> to vector<8x8xf32>
    %61 = vector.extract_strided_slice %43 {offsets = [0, 0], sizes = [8, 8], strides = [1, 1]} : vector<8x32xf32> to vector<8x8xf32>
    %62 = vector.extract_strided_slice %50 {offsets = [0, 0], sizes = [8, 8], strides = [1, 1]} : vector<8x32xf32> to vector<8x8xf32>
    %cst_32 = arith.constant dense<0.000000e+00> : vector<8x8xf32>
    %63 = tpu.matmul %60, %61, %cst_32 {dimension_numbers = #tpu.dot_dimension_numbers<[1], [1], [0], [0], [0, 0, 1, 0], [], []>} : vector<8x8xf32>, vector<8x8xf32>, vector<8x8xf32> -> vector<8x8xf32>
    %64 = vector.broadcast %59 : vector<1x8xf32> to vector<8x8xf32>
    %65 = arith.addf %63, %64 : vector<8x8xf32>
    %cst_33 = arith.constant dense<0xFF800000> : vector<8xf32>
    %66 = vector.multi_reduction <maximumf>, %65, %cst_33 [1] : vector<8x8xf32> to vector<8xf32>
    %67 = vector.shape_cast %66 : vector<8xf32> to vector<8x1xf32>
    %68 = vector.broadcast %67 : vector<8x1xf32> to vector<8x8xf32>
    %69 = arith.subf %65, %68 : vector<8x8xf32>
    %70 = math.exp %69 : vector<8x8xf32>
    %cst_34 = arith.constant dense<0.000000e+00> : vector<8xf32>
    %71 = vector.multi_reduction <add>, %70, %cst_34 [1] : vector<8x8xf32> to vector<8xf32>
    %72 = vector.shape_cast %71 : vector<8xf32> to vector<8x1xf32>
    %cst_35 = arith.constant dense<0.000000e+00> : vector<8x8xf32>
    %73 = tpu.matmul %70, %62, %cst_35 {dimension_numbers = #tpu.dot_dimension_numbers<[1], [0], [0], [1], [0, 0, 1, 1], [], []>} : vector<8x8xf32>, vector<8x8xf32>, vector<8x8xf32> -> vector<8x8xf32>
    %74 = tpu.reciprocal %72 {approx = true} : vector<8x1xf32> -> vector<8x1xf32>
    %75 = vector.broadcast %74 : vector<8x1xf32> to vector<8x8xf32>
    %76 = arith.mulf %73, %75 : vector<8x8xf32>
    %c0_36 = arith.constant 0 : index
    %c0_37 = arith.constant 0 : index
    %77 = vector.load %arg20[%c0_36, %c0_37] : memref<8x32xf32, #tpu.memory_space<vmem>>, vector<8x8xf32>
    tpu.vector_store %arg20[%c0_36, %c0_37], %76 {strides = array<i32>} : memref<8x32xf32, #tpu.memory_space<vmem>>, vector<8x8xf32>,
    %78 = vector.extract_strided_slice %52 {offsets = [0, 8], sizes = [8, 8], strides = [1, 1]} : vector<8x32xf32> to vector<8x8xf32>
    %79 = vector.extract_strided_slice %43 {offsets = [0, 8], sizes = [8, 8], strides = [1, 1]} : vector<8x32xf32> to vector<8x8xf32>
    %80 = vector.extract_strided_slice %50 {offsets = [0, 8], sizes = [8, 8], strides = [1, 1]} : vector<8x32xf32> to vector<8x8xf32>
    %cst_38 = arith.constant dense<0.000000e+00> : vector<8x8xf32>
    %81 = tpu.matmul %78, %79, %cst_38 {dimension_numbers = #tpu.dot_dimension_numbers<[1], [1], [0], [0], [0, 0, 1, 0], [], []>} : vector<8x8xf32>, vector<8x8xf32>, vector<8x8xf32> -> vector<8x8xf32>
    %82 = vector.broadcast %59 : vector<1x8xf32> to vector<8x8xf32>
    %83 = arith.addf %81, %82 : vector<8x8xf32>
    %cst_39 = arith.constant dense<0xFF800000> : vector<8xf32>
    %84 = vector.multi_reduction <maximumf>, %83, %cst_39 [1] : vector<8x8xf32> to vector<8xf32>
    %85 = vector.shape_cast %84 : vector<8xf32> to vector<8x1xf32>
    %86 = vector.broadcast %85 : vector<8x1xf32> to vector<8x8xf32>
    %87 = arith.subf %83, %86 : vector<8x8xf32>
    %88 = math.exp %87 : vector<8x8xf32>
    %cst_40 = arith.constant dense<0.000000e+00> : vector<8xf32>
    %89 = vector.multi_reduction <add>, %88, %cst_40 [1] : vector<8x8xf32> to vector<8xf32>
    %90 = vector.shape_cast %89 : vector<8xf32> to vector<8x1xf32>
    %cst_41 = arith.constant dense<0.000000e+00> : vector<8x8xf32>
    %91 = tpu.matmul %88, %80, %cst_41 {dimension_numbers = #tpu.dot_dimension_numbers<[1], [0], [0], [1], [0, 0, 1, 1], [], []>} : vector<8x8xf32>, vector<8x8xf32>, vector<8x8xf32> -> vector<8x8xf32>
    %92 = tpu.reciprocal %90 {approx = true} : vector<8x1xf32> -> vector<8x1xf32>
    %93 = vector.broadcast %92 : vector<8x1xf32> to vector<8x8xf32>
    %94 = arith.mulf %91, %93 : vector<8x8xf32>
    %c0_42 = arith.constant 0 : index
    %c8 = arith.constant 8 : index
    %95 = vector.load %arg20[%c0_42, %c8] : memref<8x32xf32, #tpu.memory_space<vmem>>, vector<8x8xf32>
    tpu.vector_store %arg20[%c0_42, %c8], %94 {strides = array<i32>} : memref<8x32xf32, #tpu.memory_space<vmem>>, vector<8x8xf32>,
    %96 = vector.extract_strided_slice %52 {offsets = [0, 16], sizes = [8, 8], strides = [1, 1]} : vector<8x32xf32> to vector<8x8xf32>
    %97 = vector.extract_strided_slice %43 {offsets = [0, 16], sizes = [8, 8], strides = [1, 1]} : vector<8x32xf32> to vector<8x8xf32>
    %98 = vector.extract_strided_slice %50 {offsets = [0, 16], sizes = [8, 8], strides = [1, 1]} : vector<8x32xf32> to vector<8x8xf32>
    %cst_43 = arith.constant dense<0.000000e+00> : vector<8x8xf32>
    %99 = tpu.matmul %96, %97, %cst_43 {dimension_numbers = #tpu.dot_dimension_numbers<[1], [1], [0], [0], [0, 0, 1, 0], [], []>} : vector<8x8xf32>, vector<8x8xf32>, vector<8x8xf32> -> vector<8x8xf32>
    %100 = vector.broadcast %59 : vector<1x8xf32> to vector<8x8xf32>
    %101 = arith.addf %99, %100 : vector<8x8xf32>
    %cst_44 = arith.constant dense<0xFF800000> : vector<8xf32>
    %102 = vector.multi_reduction <maximumf>, %101, %cst_44 [1] : vector<8x8xf32> to vector<8xf32>
    %103 = vector.shape_cast %102 : vector<8xf32> to vector<8x1xf32>
    %104 = vector.broadcast %103 : vector<8x1xf32> to vector<8x8xf32>
    %105 = arith.subf %101, %104 : vector<8x8xf32>
    %106 = math.exp %105 : vector<8x8xf32>
    %cst_45 = arith.constant dense<0.000000e+00> : vector<8xf32>
    %107 = vector.multi_reduction <add>, %106, %cst_45 [1] : vector<8x8xf32> to vector<8xf32>
    %108 = vector.shape_cast %107 : vector<8xf32> to vector<8x1xf32>
    %cst_46 = arith.constant dense<0.000000e+00> : vector<8x8xf32>
    %109 = tpu.matmul %106, %98, %cst_46 {dimension_numbers = #tpu.dot_dimension_numbers<[1], [0], [0], [1], [0, 0, 1, 1], [], []>} : vector<8x8xf32>, vector<8x8xf32>, vector<8x8xf32> -> vector<8x8xf32>
    %110 = tpu.reciprocal %108 {approx = true} : vector<8x1xf32> -> vector<8x1xf32>
    %111 = vector.broadcast %110 : vector<8x1xf32> to vector<8x8xf32>
    %112 = arith.mulf %109, %111 : vector<8x8xf32>
    %c0_47 = arith.constant 0 : index
    %c16 = arith.constant 16 : index
    %113 = vector.load %arg20[%c0_47, %c16] : memref<8x32xf32, #tpu.memory_space<vmem>>, vector<8x8xf32>
    tpu.vector_store %arg20[%c0_47, %c16], %112 {strides = array<i32>} : memref<8x32xf32, #tpu.memory_space<vmem>>, vector<8x8xf32>,
    %114 = vector.extract_strided_slice %52 {offsets = [0, 24], sizes = [8, 8], strides = [1, 1]} : vector<8x32xf32> to vector<8x8xf32>
    %115 = vector.extract_strided_slice %43 {offsets = [0, 24], sizes = [8, 8], strides = [1, 1]} : vector<8x32xf32> to vector<8x8xf32>
    %116 = vector.extract_strided_slice %50 {offsets = [0, 24], sizes = [8, 8], strides = [1, 1]} : vector<8x32xf32> to vector<8x8xf32>
    %cst_48 = arith.constant dense<0.000000e+00> : vector<8x8xf32>
    %117 = tpu.matmul %114, %115, %cst_48 {dimension_numbers = #tpu.dot_dimension_numbers<[1], [1], [0], [0], [0, 0, 1, 0], [], []>} : vector<8x8xf32>, vector<8x8xf32>, vector<8x8xf32> -> vector<8x8xf32>
    %118 = vector.broadcast %59 : vector<1x8xf32> to vector<8x8xf32>
    %119 = arith.addf %117, %118 : vector<8x8xf32>
    %cst_49 = arith.constant dense<0xFF800000> : vector<8xf32>
    %120 = vector.multi_reduction <maximumf>, %119, %cst_49 [1] : vector<8x8xf32> to vector<8xf32>
    %121 = vector.shape_cast %120 : vector<8xf32> to vector<8x1xf32>
    %122 = vector.broadcast %121 : vector<8x1xf32> to vector<8x8xf32>
    %123 = arith.subf %119, %122 : vector<8x8xf32>
    %124 = math.exp %123 : vector<8x8xf32>
    %cst_50 = arith.constant dense<0.000000e+00> : vector<8xf32>
    %125 = vector.multi_reduction <add>, %124, %cst_50 [1] : vector<8x8xf32> to vector<8xf32>
    %126 = vector.shape_cast %125 : vector<8xf32> to vector<8x1xf32>
    %cst_51 = arith.constant dense<0.000000e+00> : vector<8x8xf32>
    %127 = tpu.matmul %124, %116, %cst_51 {dimension_numbers = #tpu.dot_dimension_numbers<[1], [0], [0], [1], [0, 0, 1, 1], [], []>} : vector<8x8xf32>, vector<8x8xf32>, vector<8x8xf32> -> vector<8x8xf32>
    %128 = tpu.reciprocal %126 {approx = true} : vector<8x1xf32> -> vector<8x1xf32>
    %129 = vector.broadcast %128 : vector<8x1xf32> to vector<8x8xf32>
    %130 = arith.mulf %127, %129 : vector<8x8xf32>
    %c0_52 = arith.constant 0 : index
    %c24 = arith.constant 24 : index
    %131 = vector.load %arg20[%c0_52, %c24] : memref<8x32xf32, #tpu.memory_space<vmem>>, vector<8x8xf32>
    tpu.vector_store %arg20[%c0_52, %c24], %130 {strides = array<i32>} : memref<8x32xf32, #tpu.memory_space<vmem>>, vector<8x8xf32>,
    %c0_53 = arith.constant 0 : index
    %c0_54 = arith.constant 0 : index
    %132 = vector.load %arg20[%c0_53, %c0_54] : memref<8x32xf32, #tpu.memory_space<vmem>>, vector<8x32xf32>
    %c0_55 = arith.constant 0 : index
    %c0_56 = arith.constant 0 : index
    %133 = vector.load %arg11[%c0_55, %c0_56] : memref<32x32xf32, #tpu.memory_space<vmem>>, vector<32x32xf32>
    %cst_57 = arith.constant dense<0.000000e+00> : vector<8x32xf32>
    %134 = tpu.matmul %132, %133, %cst_57 {dimension_numbers = #tpu.dot_dimension_numbers<[1], [0], [0], [1], [0, 0, 1, 1], [], []>} : vector<8x32xf32>, vector<32x32xf32>, vector<8x32xf32> -> vector<8x32xf32>
    %c0_58 = arith.constant 0 : index
    %c0_59 = arith.constant 0 : index
    %135 = vector.load %arg12[%c0_58, %c0_59] : memref<1x32xf32, #tpu.memory_space<vmem>>, vector<1x32xf32>
    %136 = vector.shape_cast %135 : vector<1x32xf32> to vector<32xf32>
    %137 = vector.shape_cast %136 : vector<32xf32> to vector<1x32xf32>
    %138 = vector.broadcast %137 : vector<1x32xf32> to vector<8x32xf32>
    %139 = arith.addf %134, %138 : vector<8x32xf32>
    %140 = arith.addf %1, %139 : vector<8x32xf32>
    %c0_60 = arith.constant 0 : index
    %c0_61 = arith.constant 0 : index
    %141 = vector.load %arg13[%c0_60, %c0_61] : memref<1x32xf32, #tpu.memory_space<vmem>>, vector<1x32xf32>
    %142 = vector.shape_cast %141 : vector<1x32xf32> to vector<32xf32>
    %c0_62 = arith.constant 0 : index
    %c0_63 = arith.constant 0 : index
    %143 = vector.load %arg14[%c0_62, %c0_63] : memref<1x32xf32, #tpu.memory_space<vmem>>, vector<1x32xf32>
    %144 = vector.shape_cast %143 : vector<1x32xf32> to vector<32xf32>
    %cst_64 = arith.constant dense<0.000000e+00> : vector<8xf32>
    %145 = vector.multi_reduction <add>, %140, %cst_64 [1] : vector<8x32xf32> to vector<8xf32>
    %146 = vector.shape_cast %145 : vector<8xf32> to vector<8x1xf32>
    %cst_65 = arith.constant 3.200000e+01 : f32
    %147 = vector.broadcast %cst_65 : f32 to vector<8x1xf32>
    %148 = arith.divf %146, %147 : vector<8x1xf32>
    %149 = vector.broadcast %148 : vector<8x1xf32> to vector<8x32xf32>
    %150 = arith.subf %140, %149 : vector<8x32xf32>
    %151 = arith.mulf %150, %150 : vector<8x32xf32>
    %cst_66 = arith.constant dense<0.000000e+00> : vector<8xf32>
    %152 = vector.multi_reduction <add>, %151, %cst_66 [1] : vector<8x32xf32> to vector<8xf32>
    %153 = vector.shape_cast %152 : vector<8xf32> to vector<8x1xf32>
    %cst_67 = arith.constant 3.100000e+01 : f32
    %154 = vector.broadcast %cst_67 : f32 to vector<8x1xf32>
    %155 = arith.divf %153, %154 : vector<8x1xf32>
    %156 = vector.broadcast %148 : vector<8x1xf32> to vector<8x32xf32>
    %157 = arith.subf %140, %156 : vector<8x32xf32>
    %cst_68 = arith.constant 9.99999997E-7 : f32
    %158 = vector.broadcast %cst_68 : f32 to vector<8x1xf32>
    %159 = arith.addf %155, %158 : vector<8x1xf32>
    %160 = math.rsqrt %159 : vector<8x1xf32>
    %161 = vector.broadcast %160 : vector<8x1xf32> to vector<8x32xf32>
    %162 = arith.mulf %157, %161 : vector<8x32xf32>
    %163 = vector.shape_cast %142 : vector<32xf32> to vector<1x32xf32>
    %164 = vector.broadcast %163 : vector<1x32xf32> to vector<8x32xf32>
    %165 = arith.mulf %164, %162 : vector<8x32xf32>
    %166 = vector.shape_cast %144 : vector<32xf32> to vector<1x32xf32>
    %167 = vector.broadcast %166 : vector<1x32xf32> to vector<8x32xf32>
    %168 = arith.addf %165, %167 : vector<8x32xf32>
    %c0_69 = arith.constant 0 : index
    %c0_70 = arith.constant 0 : index
    %169 = vector.load %arg15[%c0_69, %c0_70] : memref<32x64xf32, #tpu.memory_space<vmem>>, vector<32x64xf32>
    %cst_71 = arith.constant dense<0.000000e+00> : vector<8x64xf32>
    %170 = tpu.matmul %168, %169, %cst_71 {dimension_numbers = #tpu.dot_dimension_numbers<[1], [0], [0], [1], [0, 0, 1, 1], [], []>} : vector<8x32xf32>, vector<32x64xf32>, vector<8x64xf32> -> vector<8x64xf32>
    %c0_72 = arith.constant 0 : index
    %c0_73 = arith.constant 0 : index
    %171 = vector.load %arg16[%c0_72, %c0_73] : memref<1x64xf32, #tpu.memory_space<vmem>>, vector<1x64xf32>
    %172 = vector.shape_cast %171 : vector<1x64xf32> to vector<64xf32>
    %173 = vector.shape_cast %172 : vector<64xf32> to vector<1x64xf32>
    %174 = vector.broadcast %173 : vector<1x64xf32> to vector<8x64xf32>
    %175 = arith.addf %170, %174 : vector<8x64xf32>
    %cst_74 = arith.constant 0.000000e+00 : f32
    %176 = vector.broadcast %cst_74 : f32 to vector<8x64xf32>
    %177 = arith.maximumf %175, %176 : vector<8x64xf32>
    %c0_75 = arith.constant 0 : index
    %c0_76 = arith.constant 0 : index
    %178 = vector.load %arg17[%c0_75, %c0_76] : memref<64x32xf32, #tpu.memory_space<vmem>>, vector<64x32xf32>
    %cst_77 = arith.constant dense<0.000000e+00> : vector<8x32xf32>
    %179 = tpu.matmul %177, %178, %cst_77 {dimension_numbers = #tpu.dot_dimension_numbers<[1], [0], [0], [1], [0, 0, 1, 1], [], []>} : vector<8x64xf32>, vector<64x32xf32>, vector<8x32xf32> -> vector<8x32xf32>
    %c0_78 = arith.constant 0 : index
    %c0_79 = arith.constant 0 : index
    %180 = vector.load %arg18[%c0_78, %c0_79] : memref<1x32xf32, #tpu.memory_space<vmem>>, vector<1x32xf32>
    %181 = vector.shape_cast %180 : vector<1x32xf32> to vector<32xf32>
    %182 = vector.shape_cast %181 : vector<32xf32> to vector<1x32xf32>
    %183 = vector.broadcast %182 : vector<1x32xf32> to vector<8x32xf32>
    %184 = arith.addf %179, %183 : vector<8x32xf32>
    %185 = arith.addf %140, %184 : vector<8x32xf32>
    %c0_80 = arith.constant 0 : index
    %c0_81 = arith.constant 0 : index
    %c0_82 = arith.constant 0 : index
    %186 = vector.load %arg19[%c0_80, %c0_81, %c0_82] : memref<1x8x32xf32, #tpu.memory_space<vmem>>, vector<1x8x32xf32>
    %187 = vector.shape_cast %186 : vector<1x8x32xf32> to vector<8x32xf32>
    %188 = vector.shape_cast %185 : vector<8x32xf32> to vector<1x8x32xf32>
    tpu.vector_store %arg19[%c0_80, %c0_81, %c0_82], %188 {strides = array<i32>} : memref<1x8x32xf32, #tpu.memory_space<vmem>>, vector<1x8x32xf32>,
    return
  }
  func.func @transform_0(%arg0: i32) -> (i32, i32, i32) {
    %c0_i32 = arith.constant 0 : i32
    %c0_i32_0 = arith.constant 0 : i32
    %c0_i32_1 = arith.constant 0 : i32
    return %arg0, %c0_i32, %c0_i32_0 : i32, i32, i32
  }
  func.func @transform_1(%arg0: i32) -> (i32, i32, i32) {
    %c0_i32 = arith.constant 0 : i32
    %c0_i32_0 = arith.constant 0 : i32
    %c0_i32_1 = arith.constant 0 : i32
    return %arg0, %c0_i32, %c0_i32_0 : i32, i32, i32
  }
  func.func @transform_2(%arg0: i32) -> (i32, i32) {
    %c0_i32 = arith.constant 0 : i32
    %c0_i32_0 = arith.constant 0 : i32
    %c0_i32_1 = arith.constant 0 : i32
    return %c0_i32, %c0_i32_0 : i32, i32
  }
  func.func @transform_3(%arg0: i32) -> (i32, i32) {
    %c0_i32 = arith.constant 0 : i32
    %c0_i32_0 = arith.constant 0 : i32
    %c0_i32_1 = arith.constant 0 : i32
    return %c0_i32, %c0_i32_0 : i32, i32
  }
  func.func @transform_4(%arg0: i32) -> (i32, i32) {
    %c0_i32 = arith.constant 0 : i32
    %c0_i32_0 = arith.constant 0 : i32
    %c0_i32_1 = arith.constant 0 : i32
    return %c0_i32, %c0_i32_0 : i32, i32
  }
  func.func @transform_5(%arg0: i32) -> (i32, i32) {
    %c0_i32 = arith.constant 0 : i32
    %c0_i32_0 = arith.constant 0 : i32
    %c0_i32_1 = arith.constant 0 : i32
    return %c0_i32, %c0_i32_0 : i32, i32
  }
  func.func @transform_6(%arg0: i32) -> (i32, i32) {
    %c0_i32 = arith.constant 0 : i32
    %c0_i32_0 = arith.constant 0 : i32
    %c0_i32_1 = arith.constant 0 : i32
    return %c0_i32, %c0_i32_0 : i32, i32
  }
  func.func @transform_7(%arg0: i32) -> (i32, i32) {
    %c0_i32 = arith.constant 0 : i32
    %c0_i32_0 = arith.constant 0 : i32
    %c0_i32_1 = arith.constant 0 : i32
    return %c0_i32, %c0_i32_0 : i32, i32
  }
  func.func @transform_8(%arg0: i32) -> (i32, i32) {
    %c0_i32 = arith.constant 0 : i32
    %c0_i32_0 = arith.constant 0 : i32
    %c0_i32_1 = arith.constant 0 : i32
    return %c0_i32, %c0_i32_0 : i32, i32
  }
  func.func @transform_9(%arg0: i32) -> (i32, i32) {
    %c0_i32 = arith.constant 0 : i32
    %c0_i32_0 = arith.constant 0 : i32
    %c0_i32_1 = arith.constant 0 : i32
    return %c0_i32, %c0_i32_0 : i32, i32
  }
  func.func @transform_10(%arg0: i32) -> (i32, i32) {
    %c0_i32 = arith.constant 0 : i32
    %c0_i32_0 = arith.constant 0 : i32
    %c0_i32_1 = arith.constant 0 : i32
    return %c0_i32, %c0_i32_0 : i32, i32
  }
  func.func @transform_11(%arg0: i32) -> (i32, i32) {
    %c0_i32 = arith.constant 0 : i32
    %c0_i32_0 = arith.constant 0 : i32
    %c0_i32_1 = arith.constant 0 : i32
    return %c0_i32, %c0_i32_0 : i32, i32
  }
  func.func @transform_12(%arg0: i32) -> (i32, i32) {
    %c0_i32 = arith.constant 0 : i32
    %c0_i32_0 = arith.constant 0 : i32
    %c0_i32_1 = arith.constant 0 : i32
    return %c0_i32, %c0_i32_0 : i32, i32
  }
  func.func @transform_13(%arg0: i32) -> (i32, i32) {
    %c0_i32 = arith.constant 0 : i32
    %c0_i32_0 = arith.constant 0 : i32
    %c0_i32_1 = arith.constant 0 : i32
    return %c0_i32, %c0_i32_0 : i32, i32
  }
  func.func @transform_14(%arg0: i32) -> (i32, i32) {
    %c0_i32 = arith.constant 0 : i32
    %c0_i32_0 = arith.constant 0 : i32
    %c0_i32_1 = arith.constant 0 : i32
    return %c0_i32, %c0_i32_0 : i32, i32
  }
  func.func @transform_15(%arg0: i32) -> (i32, i32) {
    %c0_i32 = arith.constant 0 : i32
    %c0_i32_0 = arith.constant 0 : i32
    %c0_i32_1 = arith.constant 0 : i32
    return %c0_i32, %c0_i32_0 : i32, i32
  }
  func.func @transform_16(%arg0: i32) -> (i32, i32) {
    %c0_i32 = arith.constant 0 : i32
    %c0_i32_0 = arith.constant 0 : i32
    %c0_i32_1 = arith.constant 0 : i32
    return %c0_i32, %c0_i32_0 : i32, i32
  }
  func.func @transform_17(%arg0: i32) -> (i32, i32) {
    %c0_i32 = arith.constant 0 : i32
    %c0_i32_0 = arith.constant 0 : i32
    %c0_i32_1 = arith.constant 0 : i32
    return %c0_i32, %c0_i32_0 : i32, i32
  }
  func.func @transform_18(%arg0: i32) -> (i32, i32, i32) {
    %c0_i32 = arith.constant 0 : i32
    %c0_i32_0 = arith.constant 0 : i32
    %c0_i32_1 = arith.constant 0 : i32
    return %arg0, %c0_i32, %c0_i32_0 : i32, i32, i32
  }
}

</mosaic_0001>

<bundles_post_ra>
// kernel: tpu_custom_call.1
= control target key start
LH: loop header
LB: loop body
LE: loop exit
PB: predicated region body
PF: predicated region fallthrough
CT: control target
= control target key end

     0   :  { %s3042_s0 = inlined_call_operand.hbm [shape: f32[2,8,32], index: 0, kind: input, shape index: {}]   ;;  %s3043_s1 = inlined_call_operand.vmem [shape: f32[2,1,8], index: 1, kind: input, shape index: {}]   ;;  %s3044_s2 = inlined_call_operand.vmem [shape: f32[1,32], index: 2, kind: input, shape index: {}]   ;;  %s3045_s3 = inlined_call_operand.vmem [shape: f32[1,32], index: 3, kind: input, shape index: {}]   ;;  %s3046_s4 = inlined_call_operand.vmem [shape: f32[32,32], index: 4, kind: input, shape index: {}]   ;;  %s3047_s5 = inlined_call_operand.vmem [shape: f32[1,32], index: 5, kind: input, shape index: {}]   ;;  %s3048_s6 = inlined_call_operand.vmem [shape: f32[32,32], index: 6, kind: input, shape index: {}]   ;;  %s3049_s7 = inlined_call_operand.vmem [shape: f32[1,32], index: 7, kind: input, shape index: {}]   ;;  %s3050_s8 = inlined_call_operand.vmem [shape: f32[32,32], index: 8, kind: input, shape index: {}]   ;;  %s3051_s9 = inlined_call_operand.vmem [shape: f32[1,32], index: 9, kind: input, shape index: {}]   ;;  %s3052_s10 = inlined_call_operand.hbm [shape: f32[32,32], index: 10, kind: input, shape index: {}]   ;;  %s3053_s11 = inlined_call_operand.vmem [shape: f32[1,32], index: 11, kind: input, shape index: {}]   ;;  %s3054_s12 = inlined_call_operand.vmem [shape: f32[1,32], index: 12, kind: input, shape index: {}]   ;;  %s3055_s13 = inlined_call_operand.vmem [shape: f32[1,32], index: 13, kind: input, shape index: {}]   ;;  %s3056_s14 = inlined_call_operand.hbm [shape: f32[32,64], index: 14, kind: input, shape index: {}]   ;;  %s3057_s15 = inlined_call_operand.vmem [shape: f32[1,64], index: 15, kind: input, shape index: {}]   ;;  %s3058_s16 = inlined_call_operand.vmem [shape: f32[64,32], index: 16, kind: input, shape index: {}]   ;;  %s3059_s17 = inlined_call_operand.vmem [shape: f32[1,32], index: 17, kind: input, shape index: {}]   ;;  %s3060_s18 = inlined_call_operand.hbm [shape: f32[2,8,32], index: 18, kind: output, shape index: {}]  }
   0x1   :  { %3068 = sst [smem:[#allocation15_spill]] %s3042_s0 }
   0x2   :  { %3069 = sst [smem:[#allocation16_spill]] %s3043_s1 }
   0x3   :  { %3070 = sst [smem:[#allocation17_spill]] %s3044_s2 }
   0x4   :  { %3071 = sst [smem:[#allocation18_spill]] %s3052_s10 }
   0x5   :  { %3072 = sst [smem:[#allocation19_spill]] %s3054_s12 }
   0x6   :  { %3073 = sst [smem:[#allocation20_spill]] %s3055_s13 }
   0x7   :  { %3074 = sst [smem:[#allocation21_spill]] %s3057_s15 }
   0x8   :  { %3075 = sst [smem:[#allocation22_spill]] %s3059_s17 }
   0x9   :  { %3076 = sst [smem:[#allocation23_spill]] %s3060_s18 }
   0xa   :  { %23 = vsyncpa [#allocation4], 0 }
   0xb   :  { %25 = vsyncpa [#allocation4 + $0x1], 0 }
   0xc   :  { %26 = vsyncpa [#allocation7], 0 }
   0xd   :  { %27 = vsyncpa [#allocation5], 0 }
   0xe   :  { %29 = vsyncpa [#allocation5 + $0x1], 0  ;;  %s2618_s27 = smov 0   ;;  %s2620_s28 = smov 0  }
   0xf   :  { %s2622_s29 = smov 0   ;;  %s2624_s30 = smov 0  }
  0x10 LB: > { %3077 = sst [smem:[#allocation13_spill]] %s2494_s27  ;;  %s2639_s0 = sadd.s32 4294967295, %s2506_s30   ;;  %s2506_s30 = sphi %s2624_s30, %s3106_s30   ;;  %s2502_s29 = sphi %s2622_s29, %s3105_s29   ;;  %s2498_s28 = sphi %s2620_s28, %s3104_s28   ;;  %s2494_s27 = sphi %s2618_s27, %s3103_s27  }
  0x11   : > { %s2002_s19 = sadd.s32 4294967294, %s2506_s30   ;;  %p55_p0 = scmp.ne.s32.totalorder %s2498_s28, %s2494_s27 }
  0x12   : > { %p3065_p1 = scmp.eq.s32.totalorder %s2639_s0, 0  ;;  %p447_p3 = scmp.eq.s32.totalorder %s2002_s19, 1 }
  0x13   : > { %p2003_p5 = scmp.ge.s32.totalorder %s2506_s30, 1  ;;  %p454_p7 = scmp.lt.s32.totalorder %s2506_s30, 3 }
  0x14   : > { %p2648_p4 = por %p3065_p1, %p55_p0  ;;  %p2653_p6 = por %p447_p3, %p55_p0 }
  0x15   : > { %p2658_p8 = pnand %p2003_p5, %p454_p7  ;;  %s2508_s22 = smov [#allocation6]  }
  0x16   : > { %s3078_s1 = scalar_select %p2648_p4, 1, 0 }
  0x17   : > { %s3079_s20 = scalar_select %p2653_p6, 1, 0 }
  0x18   : > { %s490_s2 = sshll.u32 %s2508_s22, 4  ;;  %p2264_p9 = pneg %p2658_p8  ;;  %s2662_s2 = int_to_ptr.vmem [resolvable:$true] %s490_s2 }
  0x19   : > { %3080 = sst [smem:[#allocation14_spill]] %s3079_s20  ;;  %s2509_s24 = smov [#allocation8]  }
  0x1a   : > { %p2669_p11 = pnand %p2264_p9, %p3065_p1  ;;  %s512_s25 = sshll.u32 %s2509_s24, 4  ;;  %s2673_s25 = int_to_ptr.vmem [resolvable:$true] %s512_s25 }
  0x1b   : > { %s3083_s10 = sld [smem:[#allocation18_spill]] }
  0x1c   : > { %p2352_p13 = pneg %p2669_p11 }
  0x21   : > { %s2350_s22 = scalar_lea.hbm %s3083_s10, 512 }
  0x22   : > { %p2351_p12 = scmp.ne.s32.totalorder %s3083_s10, %s2350_s22  ;;  %p2357_p5 = scmp.lt.u32.totalorder %s2350_s22, %s3083_s10 }
  0x24   : > { %p2353_p0 = pnand %p2352_p13, %p2351_p12 }
  0x26   : > { %p2354_p3 = pneg %p2353_p0 }
  0x28   : > { %p2359_p7 = pnand %p2357_p5, %p2354_p3 }
  0x2a   : > { %2362 = shalt.err (!%p2359_p7)
}
  0x2b   : > { %s2363_s24 = scalar_lea.vmem %s2662_s2, 512  ;;  %p2371_p2 = scmp.lt.s32.totalorder %s2662_s2, %s2662_s2 }
  0x2c   : > { %p2364_p9 = scmp.ne.s32.totalorder %s2662_s2, %s2363_s24  ;;  %p2372_p12 = scmp.lt.s32.totalorder %s2363_s24, %s2363_s24 }
  0x2e   : > { %p2366_p10 = pnand %p2364_p9, %p2352_p13  ;;  %p2373_p0 = por %p2372_p12, %p2371_p2 }
  0x30   : > { %p2367_p1 = pneg %p2366_p10 }
  0x32   : > { %p2374_p6 = pnand %p2373_p0, %p2367_p1 }
  0x34   : > { %2377 = shalt.err (!%p2374_p6)
}
  0x35   : > { %s2510_s17 = smov 128   ;;  %s2511_s18 = smov 8  }
  0x36   : > { %2267 = dma.hbm_to_vmem [thread:$0]  (!%p2669_p11), %s3083_s10, 512, %s2662_s2, [#allocation7], %s2510_s17, %s2510_s17, %s2511_s18  }
  0x37   : > { %s2378_s22 = scalar_lea.hbm %s3056_s14, 512 }
  0x38   : > { %p2379_p2 = scmp.ne.s32.totalorder %s3056_s14, %s2378_s22  ;;  %p2385_p10 = scmp.lt.u32.totalorder %s2378_s22, %s3056_s14 }
  0x3a   : > { %p2381_p1 = pnand %p2379_p2, %p2352_p13 }
  0x3c   : > { %p2382_p6 = pneg %p2381_p1 }
  0x3e   : > { %p2387_p3 = pnand %p2385_p10, %p2382_p6 }
  0x40   : > { %2390 = shalt.err (!%p2387_p3)
}
  0x41   : > { %s2391_s2 = scalar_lea.vmem %s2673_s25, 512  ;;  %p2399_p12 = scmp.lt.s32.totalorder %s2673_s25, %s2673_s25 }
  0x42   : > { %p2392_p5 = scmp.ne.s32.totalorder %s2673_s25, %s2391_s2  ;;  %p2400_p0 = scmp.lt.s32.totalorder %s2391_s2, %s2391_s2 }
  0x44   : > { %p2394_p7 = pnand %p2392_p5, %p2352_p13  ;;  %p2401_p2 = por %p2400_p0, %p2399_p12 }
  0x46   : > { %p2395_p9 = pneg %p2394_p7 }
  0x48   : > { %p2402_p1 = pnand %p2401_p2, %p2395_p9 }
  0x4a   : > { %2405 = shalt.err (!%p2402_p1)
}
  0x4b   : > { %2270 = dma.hbm_to_vmem [thread:$0]  (!%p2669_p11), %s3056_s14, 512, %s2673_s25, [#allocation7], %s2510_s17, %s2510_s17, %s2511_s18  }
  0x4c   : > { %s2728_s15 = sadd.s32 1, %s2506_s30   ;;  %s42_s23 = sadd.s32 1, %s2502_s29 }
  0x4d   : > { %s39_s27 = ssub.s32 %s2506_s30, %s2728_s15  ;;  %p49_p13 = scmp.ne.s32.totalorder %s2502_s29, %s2498_s28 }
  0x4e   : > { %p40_p6 = scmp.eq.s32.totalorder %s39_s27, 0  ;;  %p50_p10 = scmp.eq.s32.totalorder %s2506_s30, 0 }
  0x4f   : > { %p3084_p3 = scmp.eq.s32.totalorder %s2639_s0, 1  ;;  %p2281_p7 = scmp.lt.s32.totalorder %s2506_s30, 2 }
  0x50   : > { %s2744_s26 = scalar_select %p40_p6, %s2502_s29, %s42_s23  }
  0x51   : > { %p2738_p5 = por %p3084_p3, %p49_p13  ;;  %p51_p9 = por %p50_p10, %p49_p13 }
  0x52   : > { %s535_s19 = sand.u32 1, %s2502_s29   ;;  %s2008_s25 = sshll.u32 %s2506_s30, 7 }
  0x53   : > { %s3085_s20 = scalar_select %p2738_p5, 1, 0 }
  0x54   : > { %s2007_s22 = sshll.u32 %s535_s19, 3  ;;  %s3086_s24 = sld [smem:[#allocation15_spill]] }
  0x55   : > { %s539_s12 = scalar_lea.vmem [#allocation3], %s2007_s22  ;;  %p2755_p11 = pnand %p2281_p7, %p51_p9 }
  0x56   : > { %s546_s13 = sshll.u32 %s539_s12, 4  ;;  %s536_s27 = scalar_lea.sflag [#allocation4], %s535_s19  ;;  %s2753_s13 = int_to_ptr.vmem [resolvable:$true] %s546_s13 }
  0x57   : > { %p2408_p0 = pneg %p2755_p11 }
  0x5a   : > { %s2751_s2 = scalar_lea.hbm %s3086_s24, %s2008_s25  ;;  %s2411_s17 = scalar_lea.hbm %s3086_s24, 256 }
  0x5b   : > { %s2406_s10 = scalar_lea.hbm %s2751_s2, 128  ;;  %p2412_p13 = scmp.lt.u32.totalorder %s2751_s2, %s3086_s24 }
  0x5c   : > { %p2407_p12 = scmp.ne.s32.totalorder %s2751_s2, %s2406_s10  ;;  %p2413_p6 = scmp.lt.u32.totalorder %s2411_s17, %s2406_s10 }
  0x5d   : > { %p2415_p3 = scmp.lt.u32.totalorder %s2406_s10, %s2751_s2 }
  0x5e   : > { %p2409_p2 = pnand %p2408_p0, %p2407_p12  ;;  %p2414_p10 = por %p2413_p6, %p2412_p13 }
  0x60   : > { %p2410_p1 = pneg %p2409_p2  ;;  %p2416_p7 = por %p2415_p3, %p2414_p10 }
  0x62   : > { %p2417_p9 = pnand %p2416_p7, %p2410_p1 }
  0x64   : > { %2420 = shalt.err (!%p2417_p9)
}
  0x65   : > { %s2421_s19 = scalar_lea.vmem %s2753_s13, 128  ;;  %s2512_s25 = smov [#allocation3]  }
  0x66   : > { %p2422_p12 = scmp.ne.s32.totalorder %s2753_s13, %s2421_s19  ;;  %s2426_s22 = sshll.u32 %s2512_s25, 4  ;;  %s2427_s22 = int_to_ptr.vmem [resolvable:$false] %s2426_s22 }
  0x67   : > { %s2428_s18 = scalar_lea.vmem %s2427_s22, 256  ;;  %p2429_p4 = scmp.lt.s32.totalorder %s2753_s13, %s2427_s22 }
  0x68   : > { %p2424_p2 = pnand %p2422_p12, %p2408_p0  ;;  %p2430_p13 = scmp.lt.s32.totalorder %s2428_s18, %s2421_s19 }
  0x6a   : > { %p2425_p5 = pneg %p2424_p2  ;;  %p2431_p6 = por %p2430_p13, %p2429_p4 }
  0x6c   : > { %p2432_p10 = pnand %p2431_p6, %p2425_p5 }
  0x6e   : > { %2435 = shalt.err (!%p2432_p10)
}
  0x6f   : > { %2274 = dma.hbm_to_vmem [thread:$0]  (!%p2755_p11), %s2751_s2, 128, %s2753_s13, %s536_s27  }
  0x70   : > { %561 = sbr.rel (%p2658_p8) target bundleno = 2470 (0x9a6), region = 92  ;;  %s2787_s10 = sand.u32 (!%p2658_p8), 1, %s2498_s28  }
  0x71   : > { %s2010_s17 = sshll.u32 (!%p2658_p8), %s2787_s10, 3  ;;  %s564_s12 = scalar_lea.sflag (!%p2658_p8), [#allocation4], %s2787_s10 }
  0x72   : > { %s567_s19 = scalar_lea.vmem (!%p2658_p8), [#allocation3], %s2010_s17  ;;  %p3088_p4 = scmp.ne.s32.totalorder (!%p2658_p8), %s3078_s1, 0 }
  0x77   : > { %2481 = dma.done.wait (%p3088_p4), %s564_s12, 128  }
  0x78   : > { %2483 = vsyncadd (%p3088_p4), %s564_s12, 4294967168  ;;  %p3089_p5 = scmp.eq.s32.totalorder %s2639_s0, 0 }
  0x7a   : > { %2485 = dma.done.wait (%p3089_p5), [#allocation7], 1024   ;;  %p3090_p8 = pmov %p3089_p5 }
  0x7b   : > { %vm637_vm0 = vcmask 261120   ;;  %v2801_v0 = vld [vmem:[%s567_s19] sm:$0xff]  ;;  %v667_v7 = vld [vmem:[%s3046_s4] sm:$0xff]  ;;  %v2513_v10 = vmov 0.0|0.0   ;;  %v670_v14 = vld [vmem:[%s3046_s4 + $0x18] sm:$0xff]  ;;  %vm2514_vm1 = vmmov 0   ;;  %v918_v55 = vlaneseq }
  0x7c   : > { %2487 = vsyncadd (%p3090_p8), [#allocation7], 4294966272  ;;  %v638_v1 = vsel %vm637_vm0, %v2801_v0, 0.0  ;;  %v668_v8 = vld [vmem:[%s3046_s4 + $0x8] sm:$0xff]  ;;  %v832_v9 = vld [vmem:[%s3050_s8] sm:$0xff]  ;;  %2210 = vmatprep.subr.bf16.mxu1 %v2513_v10  ;;  %2222 = vmatprep.subr.bf16.mxu0 %v2513_v10  ;;  %v2515_v18 = vmov 0.0  }
  0x7d   : > { %639 = vadd.xlane.f32.xlu0 %v638_v1  ;;  %v2211_v11 = vpack.c.bf16 %v668_v8, %v667_v7  ;;  %v833_v12 = vld [vmem:[%s3050_s8 + $0x8] sm:$0xff]  ;;  %v669_v13 = vld [vmem:[%s3046_s4 + $0x10] sm:$0xff]  ;;  %v835_v17 = vld [vmem:[%s3050_s8 + $0x18] sm:$0xff]  ;;  %2104 = vmatprep.mubr.msk.f32.mxu1 %vm2514_vm1, %v2515_v18  ;;  %s3091_s22 = sld [smem:[#allocation17_spill]]  ;;  %s2516_s12 = smov 120   ;;  %vm923_vm2 = vcmask 64512  }
  0x7e   : > { %v2223_v15 = vpack.c.bf16 %v833_v12, %v832_v9  ;;  %v834_v16 = vld [vmem:[%s3050_s8 + $0x10] sm:$0xff]  ;;  %2126 = vmatprep.mubr.msk.f32.mxu0 %vm2514_vm1, %v2515_v18  ;;  %v2214_v19 = vpack.c.bf16 %v670_v14, %v669_v13  ;;  %v751_v27 = vld [vmem:[%s3048_s6] sm:$0xff]  ;;  %v752_v28 = vld [vmem:[%s3048_s6 + $0x8] sm:$0xff]  ;;  %s2517_s13 = smov 112   ;;  %s2518_s23 = smov 104   ;;  %v919_v57 = vshrl.u32 %v918_v55, 7 }
  0x7f   : > { %2212 = vmatpush3.bf16.msra.mxu1 %v2211_v11  ;;  %v2226_v20 = vpack.c.bf16 %v835_v17, %v834_v16  ;;  %v2015_v29 = vld [vmem:[%s3045_s3] ss:$0 sm:$0xff]  ;;  %v2217_v31 = vpack.c.bf16 %v752_v28, %v751_v27  ;;  %v753_v33 = vld [vmem:[%s3048_s6 + $0x10] sm:$0xff]  ;;  %v754_v34 = vld [vmem:[%s3048_s6 + $0x18] sm:$0xff]  ;;  %p631_p11 = scmp.lt.s32.totalorder %s2639_s0, 1  ;;  %s3092_s18 = sld [smem:[#allocation16_spill]] }
  0x80   : > { %2224 = vmatpush3.bf16.msra.mxu0 %v2223_v15  ;;  %2213 = vmatprep.subr.bf16.mxu1 %v2513_v10  ;;  %v2220_v35 = vpack.c.bf16 %v754_v34, %v753_v33  ;;  %v2016_v36 = vld [vmem:[%s3047_s5] ss:$0 sm:$0xff]  ;;  %v920_v58 = vsub.s32 0, %v919_v57  ;;  %s2520_s1 = smov 16   ;;  %s2521_s21 = smov 24   ;;  %vm1255_vm4 = vcmask 130112  }
  0x81   : > { %2225 = vmatprep.subr.bf16.mxu0 %v2513_v10  ;;  %v2018_v43 = vld [vmem:[%s3049_s7] ss:$0 sm:$0xff]  ;;  %s632_s27 = scalar_select %p631_p11, %s2639_s0, 1  ;;  %vm1426_vm5 = vcmask 195712   ;;  %vm1597_vm6 = vcmask 261312   ;;  %vm1814_vm7 = vcmask 523264  }
  0x82   : > { %v2020_v47 = vld [vmem:[%s3051_s9] ss:$0 sm:$0xff]  ;;  %s3095_s25 = sld [smem:[#allocation21_spill]]  ;;  %p3098_p1 = scmp.ne.s32.totalorder %s3085_s20, 0 }
  0x83   : > { %2215 = vmatpush3.bf16.msra.mxu1 %v2214_v19  ;;  %v2014_v25 = vld [vmem:[%s3091_s22] ss:$0 sm:$0xff]  ;;  %s3093_s22 = sld [smem:[#allocation19_spill]] }
  0x84   : > { %2227 = vmatpush3.bf16.msra.mxu0 %v2226_v20  ;;  %2216 = vmatprep.subr.bf16.mxu1 %v2513_v10 }
  0x85   : > { %2139 = vmatprep.subr.mxu0 %v2515_v18  ;;  %s633_s19 = scalar_lea.vmem %s3092_s18, %s632_s27 }
  0x86   : > { %v914_v56 = vld [vmem:[%s633_s19] sm:$0x1]  ;;  %s3096_s19 = sld [smem:[#allocation22_spill]] }
  0x87   : > { %vm915_vm3 = vcmp.eq.f32.partialorder %v914_v56, 0.0 }
  0x88   : > { %v916_v59 = vsel %vm915_vm3, -1e+09, %v2515_v18 }
  0x89   : > { %v921_v60 = vrot.slane %v916_v59, %v920_v58 }
 0x10a   : > { %v640_v2 = vpop.xlane.xlu0 %639 }
 0x10b   : > { %v642_v3 = vmul.f32 0.03125, %v640_v2 }
 0x10d   : > { %v643_v4 = vsub.f32 %v2801_v0, %v642_v3 }
 0x10f   : > { %v644_v5 = vmul.f32 %v643_v4, %v643_v4 }
 0x111   : > { %v645_v6 = vsel %vm637_vm0, %v644_v5, 0.0 }
 0x112   : > { %646 = vadd.xlane.f32.xlu0 %v645_v6 }
 0x19f   : > { %v647_v21 = vpop.xlane.xlu0 %646 }
 0x1a0   : > { %v649_v22 = vmul.f32 0.032258064, %v647_v21 }
 0x1a2   : > { %v650_v23 = vadd.f32 1e-06, %v649_v22 }
 0x1a4   : > { %2330 = vrsqrt.f32 %v650_v23 }
 0x1ae   : > { %v2331_v24 = vpop.eup %2330 }
 0x1af   : > { %v652_v26 = vmul.f32 %v2331_v24, %v643_v4 }
 0x1b1   : > { %v659_v30 = vmul.f32 %v2014_v25, %v652_v26 }
 0x1b3   : > { %v666_v32 = vadd.f32 %v2015_v29, %v659_v30 }
 0x1b5   : > { %2105 = vmatmul.mubr.msk.f32.vlgmr.msra.gmra.mrb[0].mxu1 %vm637_vm0, %v666_v32  ;;  %2127 = vmatmul.mubr.msk.f32.vlgmr.msra.gmra.mrb[0].mxu0 %vm637_vm0, %v666_v32 }
 0x1b6   : > { %2218 = vmatpush3.bf16.msra.mxu1 %v2217_v31  ;;  %2115 = vmatprep.mubr.msk.f32.mxu1 %vm2514_vm1, %v2515_v18 }
 0x1b7   : > { %2219 = vmatprep.subr.bf16.mxu1 %v2513_v10  ;;  %2141 = vmatprep.mubr.msk.f32.mxu0 %vm2514_vm1, %v2515_v18 }
 0x1ba   : > { %2221 = vmatpush3.bf16.msra.mxu1 %v2220_v35 }
 0x1bb   : > { %2129 = vmatprep.subr.mxu1 %v2515_v18 }
 0x1bd   : > { %2116 = vmatmul.mubr.msk.f32.vlgmr.msra.gmra.mrb[2].mxu1 %vm637_vm0, %v666_v32 }
 0x1be   : > { %2131 = vmatprep.mubr.msk.f32.mxu1 %vm2514_vm1, %v2515_v18 }
 0x288   : > { %v747_v37 = vpop.f32.mrb[0].mxu1  ;;  %v909_v38 = vpop.f32.mrb[0].mxu0 }
 0x289   : > { %v748_v39 = vadd.f32 %v2016_v36, %v747_v37  ;;  %v2106_v40 = vpop.f32.mrb[1].mxu1  ;;  %v2128_v41 = vpop.f32.mrb[1].mxu0  ;;  %v910_v48 = vadd.f32 %v2020_v47, %v909_v38  ;;  %v1600_v47 = vld [vmem:[#allocation6] sm:$0xff] }
 0x28b   : > { %v913_v42 = vmul.f32 0.35355338, %v748_v39 }
 0x28d   : > { %1085 = vrot.lane.b32.xlu1 %v913_v42, %s2516_s12 }
 0x290   : > { %v828_v44 = vpop.f32.mrb[2].mxu1 }
 0x291   : > { %v829_v45 = vadd.f32 %v2018_v43, %v828_v44  ;;  %v2117_v46 = vpop.f32.mrb[3].mxu1 }
 0x293   : > { %1259 = vrot.lane.b32.xlu0 %v829_v45, %s2517_s13  ;;  %1087 = vrot.lane.b32.xlu1 %v829_v45, %s2516_s12 }
 0x294   : > { %2130 = vmatpush3.xpose.msk.msra.mxu1 %vm923_vm2, %v829_v45 }
 0x295   : > { %2134 = vmatprep.subr.mxu1 %v2515_v18 }
 0x297   : > { %2132 = vmatmul.mubr.msk.f32.vlgmr.msra.gmra.mrb[4].mxu1 %vm923_vm2, %v913_v42  ;;  %1257 = vrot.lane.b32.xlu1 %v913_v42, %s2517_s13 }
 0x298   : > { %2135 = vmatpush3.msra.mxu1 %v910_v48  ;;  %2136 = vmatprep.mubr.msk.f32.mxu1 %vm2514_vm1, %v2515_v18 }
 0x299   : > { %2144 = vmatprep.subr.mxu1 %v2515_v18 }
 0x29b   : > { %1430 = vrot.lane.b32.xlu1 %v829_v45, %s2518_s23 }
 0x29f   : > { %1428 = vrot.lane.b32.xlu1 %v913_v42, %s2518_s23 }
 0x2ff   : > { %v1086_v49 = vpop.permute.xlu1 %1085 }
 0x305   : > { %v1088_v50 = vpop.permute.xlu1 %1087  ;;  %v1260_v51 = vpop.permute.xlu0 %1259 }
 0x306   : > { %2140 = vmatpush3.xpose.msk.msra.mxu0 %vm923_vm2, %v1088_v50  ;;  %v1602_v50 = vld [vmem:[#allocation6 + $0x10] sm:$0xff] }
 0x307   : > { %2149 = vmatprep.subr.mxu0 %v2515_v18 }
 0x309   : > { %2142 = vmatmul.mubr.msk.f32.vlgmr.msra.gmra.mrb[2].mxu0 %vm923_vm2, %v1086_v49  ;;  %v1258_v52 = vpop.permute.xlu1 %1257 }
 0x30a   : > { %2150 = vmatpush3.xpose.msk.msra.mxu0 %vm923_vm2, %v1260_v51  ;;  %2151 = vmatprep.mubr.msk.f32.mxu0 %vm2514_vm1, %v2515_v18  ;;  %v1603_v51 = vld [vmem:[#allocation6 + $0x18] sm:$0xff] }
 0x30b   : > { %2159 = vmatprep.subr.mxu0 %v2515_v18  ;;  %v2232_v56 = vpack.c.bf16 %v1603_v51, %v1602_v50 }
 0x30d   : > { %2152 = vmatmul.mubr.msk.f32.vlgmr.msra.gmra.mrb[4].mxu0 %vm923_vm2, %v1258_v52  ;;  %v1431_v53 = vpop.permute.xlu1 %1430 }
 0x30e   : > { %2160 = vmatpush3.xpose.msk.msra.mxu0 %vm923_vm2, %v1431_v53  ;;  %2161 = vmatprep.mubr.msk.f32.mxu0 %vm2514_vm1, %v2515_v18 }
 0x30f   : > { %2228 = vmatprep.subr.bf16.mxu0 %v2513_v10 }
 0x311   : > { %v1429_v54 = vpop.permute.xlu1 %1428 }
 0x312   : > { %2162 = vmatmul.mubr.msk.f32.vlgmr.msra.gmra.mrb[6].mxu0 %vm923_vm2, %v1429_v54 }
 0x313   : > { %2177 = vmatprep.mubr.msk.f32.mxu0 %vm2514_vm1, %v2515_v18 }
 0x36a   : > { %v996_v61 = vpop.f32.mrb[4].mxu1 }
 0x36b   : > { %v997_v62 = vadd.f32 %v996_v61, %v921_v60  ;;  %v2133_v63 = vpop.f32.mrb[5].mxu1 }
 0x36d   : > { %v1000_v1 = vsel %vm923_vm2, %v997_v62, -inf }
 0x36e   : > { %1001 = vmax.xlane.f32.xlu1 %v1000_v1 }
 0x37f   : > { %1344 = vrot.lane.b32.xlu1 %v910_v48, %s2517_s13 }
 0x3dc   : > { %v1159_v2 = vpop.f32.mrb[2].mxu0 }
 0x3dd   : > { %v1160_v3 = vadd.f32 %v1159_v2, %v921_v60  ;;  %v2143_v4 = vpop.f32.mrb[3].mxu0 }
 0x3df   : > { %v1163_v5 = vsel %vm923_vm2, %v1160_v3, -inf }
 0x3e0   : > { %1164 = vmax.xlane.f32.xlu0 %v1163_v5  ;;  %v1331_v6 = vpop.f32.mrb[4].mxu0 }
 0x3e1   : > { %v1332_v7 = vadd.f32 %v1331_v6, %v921_v60  ;;  %v2153_v8 = vpop.f32.mrb[5].mxu0  ;;  %v2034_v6 = vld [vmem:[%s3053_s11] ss:$0 sm:$0xff] }
 0x3e3   : > { %v1335_v9 = vsel %vm923_vm2, %v1332_v7, -inf }
 0x3e4   : > { %1336 = vmax.xlane.f32.xlu1 %v1335_v9 }
 0x3e5   : > { %v1502_v11 = vpop.f32.mrb[6].mxu0 }
 0x3e6   : > { %v1503_v12 = vadd.f32 %v1502_v11, %v921_v60  ;;  %v2163_v13 = vpop.f32.mrb[7].mxu0 }
 0x3e8   : > { %v1506_v14 = vsel %vm923_vm2, %v1503_v12, -inf }
 0x3e9   : > { %1507 = vmax.xlane.f32.xlu1 %v1506_v14 }
 0x3f6   : > { %1173 = vrot.lane.b32.xlu0 %v910_v48, %s2516_s12  ;;  %s2519_s12 = smov 8  }
 0x3fa   : > { %1515 = vrot.lane.b32.xlu1 %v910_v48, %s2518_s23  ;;  %v1601_v48 = vld [vmem:[#allocation6 + $0x8] sm:$0xff]  ;;  %s3097_s23 = sld [smem:[#allocation23_spill]] }
 0x3fb   : > { %v1002_v15 = vpop.xlane.xlu1 %1001  ;;  %v2229_v49 = vpack.c.bf16 %v1601_v48, %v1600_v47  ;;  %v2040_v48 = vld [vmem:[%s3096_s19] ss:$0 sm:$0xff] }
 0x3fc   : > { %v1003_v16 = vsub.f32 %v997_v62, %v1002_v15 }
 0x3fd   : > { %2230 = vmatpush3.bf16.msra.mxu0 %v2229_v49 }
 0x3fe   : > { %v1004_v17 = vmul.f32 1.442695, %v1003_v16  ;;  %2231 = vmatprep.subr.bf16.mxu0 %v2513_v10 }
 0x3ff   : > { %v1345_v20 = vpop.permute.xlu1 %1344 }
 0x400   : > { %2332 = vpow2.f32 %v1004_v17 }
 0x401   : > { %2233 = vmatpush3.bf16.msra.mxu0 %v2232_v56 }
 0x402   : > { %2240 = vmatprep.subr.bf16.mxu0 %v2513_v10 }
 0x40a   : > { %v2333_v19 = vpop.eup %2332 }
 0x40b   : > { %2137 = vmatmul.mubr.msk.f32.vlgmr.msra.gmra.mrb[6].mxu1 %vm923_vm2, %v2333_v19  ;;  %v1006_v38 = vsel %vm923_vm2, %v2333_v19, 0.0  ;;  %v1715_v19 = vld [vmem:[#allocation8 + $0x8] sm:$0xff] }
 0x40c   : > { %2146 = vmatprep.mubr.msk.f32.mxu1 %vm2514_vm1, %v2515_v18 }
 0x46d   : > { %v1165_v21 = vpop.xlane.xlu0 %1164 }
 0x46e   : > { %v1166_v22 = vsub.f32 %v1160_v3, %v1165_v21  ;;  %v1716_v21 = vld [vmem:[#allocation8 + $0x10] sm:$0xff] }
 0x470   : > { %v1167_v23 = vmul.f32 1.442695, %v1166_v22  ;;  %v1717_v22 = vld [vmem:[#allocation8 + $0x18] sm:$0xff] }
 0x471   : > { %v1174_v24 = vpop.permute.xlu0 %1173  ;;  %v1337_v25 = vpop.xlane.xlu1 %1336 }
 0x472   : > { %2334 = vpow2.f32 %v1167_v23  ;;  %v1338_v26 = vsub.f32 %v1332_v7, %v1337_v25  ;;  %2145 = vmatpush3.msra.mxu1 %v1174_v24  ;;  %v2238_v23 = vpack.c.bf16 %v1717_v22, %v1716_v21  ;;  %v1800_v24 = vld [vmem:[%s3058_s16 + $0x8] sm:$0xff]  ;;  %v1801_v25 = vld [vmem:[%s3058_s16 + $0x10] sm:$0xff] }
 0x473   : > { %2154 = vmatprep.subr.mxu1 %v2515_v18 }
 0x474   : > { %v1339_v27 = vmul.f32 1.442695, %v1338_v26 }
 0x476   : > { %2336 = vpow2.f32 %v1339_v27  ;;  %v1508_v28 = vpop.xlane.xlu1 %1507  ;;  %v1802_v27 = vld [vmem:[%s3058_s16 + $0x18] sm:$0xff] }
 0x477   : > { %v1509_v29 = vsub.f32 %v1503_v12, %v1508_v28  ;;  %v2244_v28 = vpack.c.bf16 %v1802_v27, %v1801_v25 }
 0x479   : > { %v1510_v30 = vmul.f32 1.442695, %v1509_v29  ;;  %v1803_v29 = vld [vmem:[%s3058_s16 + $0x20] sm:$0xff] }
 0x47a   : > { %v1516_v34 = vpop.permute.xlu1 %1515 }
 0x47b   : > { %2338 = vpow2.f32 %v1510_v30  ;;  %v1804_v30 = vld [vmem:[%s3058_s16 + $0x28] sm:$0xff] }
 0x47c   : > { %v2335_v31 = vpop.eup %2334 }
 0x47d   : > { %2147 = vmatmul.mubr.msk.f32.vlgmr.msra.gmra.mrb[8].mxu1 %vm923_vm2, %v2335_v31  ;;  %v1169_v32 = vsel %vm923_vm2, %v2335_v31, 0.0  ;;  %v2247_v31 = vpack.c.bf16 %v1804_v30, %v1803_v29 }
 0x47e   : > { %2155 = vmatpush3.msra.mxu1 %v1345_v20  ;;  %1170 = vadd.xlane.f32.xlu0 %v1169_v32 }
 0x47f   : > { %2156 = vmatprep.mubr.msk.f32.mxu1 %vm2514_vm1, %v2515_v18  ;;  %2164 = vmatprep.subr.mxu1 %v2515_v18 }
 0x480   : > { %v2337_v33 = vpop.eup %2336 }
 0x481   : > { %2157 = vmatmul.mubr.msk.f32.vlgmr.msra.gmra.mrb[10].mxu1 %vm923_vm2, %v2337_v33  ;;  %v1341_v35 = vsel %vm923_vm2, %v2337_v33, 0.0 }
 0x482   : > { %2165 = vmatpush3.msra.mxu1 %v1516_v34  ;;  %1342 = vadd.xlane.f32.xlu1 %v1341_v35 }
 0x483   : > { %2166 = vmatprep.mubr.msk.f32.mxu1 %vm2514_vm1, %v2515_v18  ;;  %2234 = vmatprep.subr.bf16.mxu1 %v2513_v10 }
 0x485   : > { %v2339_v36 = vpop.eup %2338 }
 0x486   : > { %2167 = vmatmul.mubr.msk.f32.vlgmr.msra.gmra.mrb[12].mxu1 %vm923_vm2, %v2339_v36  ;;  %v1512_v37 = vsel %vm923_vm2, %v2339_v36, 0.0  ;;  %v2036_v36 = vld [vmem:[%s3093_s22] ss:$0 sm:$0xff] }
 0x487   : > { %1513 = vadd.xlane.f32.xlu0 %v1512_v37  ;;  %2188 = vmatprep.mubr.msk.f32.mxu1 %vm2514_vm1, %v2515_v18 }
 0x48b   : > { %1007 = vadd.xlane.f32.xlu0 %v1006_v38 }
 0x4de   : > { %v1078_v39 = vpop.f32.mrb[6].mxu1 }
 0x4df   : > { %v2138_v40 = vpop.f32.mrb[7].mxu1 }
 0x50b   : > { %v1171_v41 = vpop.xlane.xlu0 %1170 }
 0x50f   : > { %v1343_v46 = vpop.xlane.xlu1 %1342 }
 0x514   : > { %v1514_v42 = vpop.xlane.xlu0 %1513 }
 0x518   : > { %v1008_v43 = vpop.xlane.xlu0 %1007 }
 0x519   : > { %2340 = vrcp.f32 %v1008_v43  ;;  %v2038_v43 = vld [vmem:[%s3095_s25] ss:$0 sm:$0xff]  ;;  %s1891_s25 = scalar_lea.sflag [#allocation5], %s2787_s10 }
 0x51a   : > { %2342 = vrcp.f32 %v1171_v41  ;;  %v1806_v41 = vld [vmem:[%s3058_s16 + $0x38] sm:$0xff] }
 0x51b   : > { %2344 = vrcp.f32 %v1343_v46 }
 0x51c   : > { %2346 = vrcp.f32 %v1514_v42 }
 0x523   : > { %v2341_v44 = vpop.eup %2340 }
 0x524   : > { %v1083_v45 = vmul.f32 %v2341_v44, %v1078_v39  ;;  %v2343_v52 = vpop.eup %2342 }
 0x525   : > { %v2345_v57 = vpop.eup %2344 }
 0x526   : > { %1084 = vst.msk [vmem:[#allocation2] sm:$0xff] %vm923_vm2, %v1083_v45  ;;  %v2347_v61 = vpop.eup %2346 }
 0x550   : > { %v1245_v53 = vpop.f32.mrb[8].mxu1 }
 0x551   : > { %v1250_v54 = vmul.f32 %v2343_v52, %v1245_v53  ;;  %v2148_v55 = vpop.f32.mrb[9].mxu1 }
 0x553   : > { %1252 = vrot.lane.b32.xlu1 %v1250_v54, %s2519_s12  ;;  %s3094_s12 = sld [smem:[#allocation20_spill]] }
 0x554   : > { %v1416_v58 = vpop.f32.mrb[10].mxu1 }
 0x555   : > { %v1421_v59 = vmul.f32 %v2345_v57, %v1416_v58  ;;  %v2158_v60 = vpop.f32.mrb[11].mxu1 }
 0x557   : > { %1423 = vrot.lane.b32.xlu0 %v1421_v59, %s2520_s1  ;;  %s630_s1 = scalar_lea.vmem [#allocation9], %s2010_s17  ;;  %s2522_s17 = smov [#allocation9]  }
 0x558   : > { %s2440_s22 = sshll.u32 %s2522_s17, 4  ;;  %s2441_s22 = int_to_ptr.vmem [resolvable:$false] %s2440_s22 }
 0x559   : > { %v1587_v62 = vpop.f32.mrb[12].mxu1  ;;  %v2037_v38 = vld [vmem:[%s3094_s12] ss:$0 sm:$0xff]  ;;  %s2043_s12 = sshll.u32 %s2639_s0, 7  ;;  %s2442_s18 = scalar_lea.vmem %s2441_s22, 256 }
 0x55a   : > { %v1592_v63 = vmul.f32 %v2347_v61, %v1587_v62  ;;  %v2168_v1 = vpop.f32.mrb[13].mxu1  ;;  %s2997_s27 = scalar_lea.hbm %s3097_s23, %s2043_s12 }
 0x55c   : > { %1594 = vrot.lane.b32.xlu1 %v1592_v63, %s2521_s21  ;;  %s1904_s21 = sshll.u32 %s630_s1, 4  ;;  %s2999_s21 = int_to_ptr.vmem [resolvable:$true] %s1904_s21 }
 0x55d   : > { %s2436_s0 = scalar_lea.vmem %s2999_s21, 128  ;;  %p2443_p9 = scmp.lt.s32.totalorder %s2999_s21, %s2441_s22 }
 0x55e   : > { %p2437_p0 = scmp.ne.s32.totalorder %s2999_s21, %s2436_s0  ;;  %p2444_p12 = scmp.lt.s32.totalorder %s2442_s18, %s2436_s0 }
 0x560   : > { %p2438_p3 = pnand %p2437_p0, %p3098_p1  ;;  %p2445_p2 = por %p2444_p12, %p2443_p9 }
 0x562   : > { %p2439_p7 = pneg %p2438_p3 }
 0x564   : > { %p2446_p13 = pnand %p2445_p2, %p2439_p7 }
 0x5c5   : > { %v1253_v2 = vpop.permute.xlu1 %1252 }
 0x5c6   : > { %1256 = vst.msk [vmem:[#allocation2] sm:$0xff] %vm1255_vm4, %v1253_v2 }
 0x5c9   : > { %v1424_v3 = vpop.permute.xlu0 %1423 }
 0x5ca   : > { %1427 = vst.msk [vmem:[#allocation2] sm:$0xff] %vm1426_vm5, %v1424_v3 }
 0x5ce   : > { %v1595_v4 = vpop.permute.xlu1 %1594 }
 0x5cf   : > { %1598 = vst.msk [vmem:[#allocation2] sm:$0xff] %vm1597_vm6, %v1595_v4 }
 0x5d6   : > { %v1599_v5 = vld [vmem:[#allocation2] sm:$0xff] }
 0x5d7   : > { %2178 = vmatmul.mubr.msk.f32.vlgmr.msra.gmra.mrb[8].mxu0 %vm637_vm0, %v1599_v5 }
 0x5d8   : > { %2207 = vmatprep.mubr.msk.f32.mxu0 %vm2514_vm1, %v2515_v18  ;;  %v1714_v18 = vld [vmem:[#allocation8] sm:$0xff] }
 0x5d9   : > { %v2235_v20 = vpack.c.bf16 %v1715_v19, %v1714_v18 }
 0x5db   : > { %2236 = vmatpush3.bf16.msra.mxu1 %v2235_v20 }
 0x5dc   : > { %2237 = vmatprep.subr.bf16.mxu1 %v2513_v10 }
 0x5df   : > { %2239 = vmatpush3.bf16.msra.mxu1 %v2238_v23 }
 0x6aa   : > { %v1680_v7 = vpop.f32.mrb[8].mxu0 }
 0x6ab   : > { %v1681_v8 = vadd.f32 %v2034_v6, %v1680_v7  ;;  %v2179_v9 = vpop.f32.mrb[9].mxu0 }
 0x6ad   : > { %v1684_v11 = vadd.f32 %v1681_v8, %v2801_v0  ;;  %v1799_v0 = vld [vmem:[%s3058_s16] sm:$0xff] }
 0x6ae   : > { %v2241_v26 = vpack.c.bf16 %v1800_v24, %v1799_v0 }
 0x6af   : > { %v1687_v12 = vsel %vm637_vm0, %v1684_v11, 0.0 }
 0x6b0   : > { %1688 = vadd.xlane.f32.xlu1 %v1687_v12  ;;  %2242 = vmatpush3.bf16.msra.mxu0 %v2241_v26 }
 0x6b1   : > { %2243 = vmatprep.subr.bf16.mxu0 %v2513_v10 }
 0x6b4   : > { %2245 = vmatpush3.bf16.msra.mxu0 %v2244_v28 }
 0x6b5   : > { %2246 = vmatprep.subr.bf16.mxu0 %v2513_v10 }
 0x6b8   : > { %2248 = vmatpush3.bf16.msra.mxu0 %v2247_v31 }
 0x6b9   : > { %2249 = vmatprep.subr.bf16.mxu0 %v2513_v10  ;;  %v1805_v10 = vld [vmem:[%s3058_s16 + $0x30] sm:$0xff] }
 0x6ba   : > { %v2250_v42 = vpack.c.bf16 %v1806_v41, %v1805_v10 }
 0x6bc   : > { %2251 = vmatpush3.bf16.msra.mxu0 %v2250_v42 }
 0x73d   : > { %v1689_v13 = vpop.xlane.xlu1 %1688 }
 0x73e   : > { %v1690_v14 = vmul.f32 0.03125, %v1689_v13 }
 0x740   : > { %v1691_v15 = vsub.f32 %v1684_v11, %v1690_v14 }
 0x742   : > { %v1692_v16 = vmul.f32 %v1691_v15, %v1691_v15 }
 0x744   : > { %v1693_v17 = vsel %vm637_vm0, %v1692_v16, 0.0 }
 0x745   : > { %1694 = vadd.xlane.f32.xlu0 %v1693_v17 }
 0x7d2   : > { %v1695_v32 = vpop.xlane.xlu0 %1694 }
 0x7d3   : > { %v1696_v33 = vmul.f32 0.032258064, %v1695_v32 }
 0x7d5   : > { %v1697_v34 = vadd.f32 1e-06, %v1696_v33 }
 0x7d7   : > { %2348 = vrsqrt.f32 %v1697_v34 }
 0x7e1   : > { %v2349_v35 = vpop.eup %2348 }
 0x7e2   : > { %v1699_v37 = vmul.f32 %v2349_v35, %v1691_v15 }
 0x7e4   : > { %v1706_v39 = vmul.f32 %v2036_v36, %v1699_v37 }
 0x7e6   : > { %v1713_v40 = vadd.f32 %v2037_v38, %v1706_v39 }
 0x7e8   : > { %2189 = vmatmul.mubr.msk.f32.vlgmr.msra.gmra.mrb[14].mxu1 %vm637_vm0, %v1713_v40 }
 0x8bb   : > { %v1794_v44 = vpop.f32.mrb[14].mxu1 }
 0x8bc   : > { %v1795_v45 = vadd.f32 %v2038_v43, %v1794_v44  ;;  %v2190_v46 = vpop.f32.mrb[15].mxu1 }
 0x8be   : > { %v1798_v47 = vmax.f32 %v1795_v45, 0.0 }
 0x8c0   : > { %2208 = vmatmul.mubr.msk.f32.vlgmr.msra.gmra.mrb[10].mxu0 %vm1814_vm7, %v1798_v47 }
 0x993   : > { %v1884_v49 = vpop.f32.mrb[10].mxu0 }
 0x994   : > { %v1885_v50 = vadd.f32 %v2040_v48, %v1884_v49  ;;  %v2209_v51 = vpop.f32.mrb[11].mxu0 }
 0x996   : > { %v1888_v52 = vadd.f32 %v1885_v50, %v1684_v11 }
 0x998   : > { %1889 = vst.msk [vmem:[%s630_s1] sm:$0xff] %vm637_vm0, %v1888_v52 }
 0x999   : > { %2449 = shalt.err (!%p2446_p13)
}
 0x99a   : > { %s2450_s10 = scalar_lea.hbm %s2997_s27, 128  ;;  %s2454_s1 = scalar_lea.hbm %s3097_s23, 256 }
 0x99b   : > { %p2451_p6 = scmp.ne.s32.totalorder %s2997_s27, %s2450_s10  ;;  %p2455_p5 = scmp.lt.u32.totalorder %s2997_s27, %s3097_s23 }
 0x99c   : > { %p2456_p8 = scmp.lt.u32.totalorder %s2454_s1, %s2450_s10  ;;  %p2458_p0 = scmp.lt.u32.totalorder %s2450_s10, %s2997_s27 }
 0x99d   : > { %p2452_p10 = pnand %p2451_p6, %p3098_p1 }
 0x99e   : > { %p2457_p11 = por %p2456_p8, %p2455_p5 }
 0x99f   : > { %p2453_p4 = pneg %p2452_p10 }
 0x9a0   : > { %p2459_p3 = por %p2458_p0, %p2457_p11 }
 0x9a2   : > { %p2460_p7 = pnand %p2459_p3, %p2453_p4 }
 0x9a4   : > { %2463 = shalt.err (!%p2460_p7)
}
 0x9a5   : > { %2262 = dma.vmem_to_hbm [thread:$0]  (%p3098_p1), %s2999_s21, 128, %s2997_s27, %s1891_s25  }
 0x9a6 PF: > { %s3099_s0 = sld [smem:[#allocation13_spill]]  ;;  %s3100_s17 = sld [smem:[#allocation14_spill]] }
 0x9a7   : > { %p3102_p12 = scmp.ge.s32.totalorder %s2506_s30, 2 }
 0x9ac   : > { %s1916_s22 = sand.u32 1, %s3099_s0   ;;  %p3101_p9 = scmp.ne.s32.totalorder %s3100_s17, 0 }
 0x9ad   : > { %s1917_s18 = scalar_lea.sflag [#allocation5], %s1916_s22 }
 0x9ae   : > { %p2276_p2 = pnand %p3102_p12, %p3101_p9 }
 0x9b0   : > { %2489 = dma.done.wait (!%p2276_p2), %s1917_s18, 128  }
 0x9b1   : > { %2491 = vsyncadd (!%p2276_p2), %s1917_s18, 4294967168  ;;  %p32_p13 = scmp.ge.s32.totalorder %s2728_s15, 4   ;;  %s3103_s27 = smov %s2498_s28 }
 0x9b2   : > { %s3104_s28 = smov %s2502_s29  ;;  %s3105_s29 = smov %s2744_s26 }
 0x9b3   : > { %s3106_s30 = smov %s2728_s15  ;;  %34 = sbr.rel (!%p32_p13) target bundleno = 16 (0x10), region = 148 }
 0x9ba   :  { %1922 = vsyncpa [#allocation4], 1 }
 0x9bb   :  { %1924 = vsyncpa [#allocation4 + $0x1], 1 }
 0x9bc   :  { %1925 = vsyncpa [#allocation7], 1 }
 0x9bd   :  { %1926 = vsyncpa [#allocation5], 1 }
 0x9be   :  { %1928 = vsyncpa [#allocation5 + $0x1], 1 }

</bundles_post_ra>
